<compile_context>
chip_gen: v7x
topology: tpu7x:2x2x1
jax: 0.10.0
libtpu: 0.0.40
codegen_flags: <defaults>
</compile_context>

<pallas_src>
import jax
import jax.numpy as jnp
from jax.experimental import pallas as pl
from jax.experimental.pallas import tpu as pltpu

_INV_SQRT2 = 0.7071067811865476
_SQRT_2_OVER_PI = 0.7978845608028654


# ----------------------------- Pallas kernel -------------------------------

def _cmlp_kernel(x_ref, w1_ref, b1_ref, w2_ref, b2_ref, o_ref):
    # x_ref : (Cin,  ts)  f32     (batch dim squeezed away by BlockSpec)
    # w1_ref: (Chid, Cin) bf16    b1_ref: (Chid, 1) f32
    # w2_ref: (Cout, Chid) bf16   b2_ref: (Cout, 1) f32
    # o_ref : (Cout, ts)  f32     -> spatial axis on lanes: dense stores.
    xb = x_ref[...].astype(jnp.bfloat16)

    # fc1 on the MXU: (Chid, Cin) @ (Cin, ts), f32 accumulation.
    h = jnp.dot(w1_ref[...], xb, preferred_element_type=jnp.float32)
    h = h + b1_ref[...]                                   # broadcast over lanes

    # GELU, tanh approximation (tanh -> EUP slot; math kept in f32 for v5e).
    h = 0.5 * h * (1.0 + jnp.tanh(_SQRT_2_OVER_PI * (h + 0.044715 * h * h * h)))

    # fc2 on the MXU: (Cout, Chid) @ (Chid, ts), f32 accumulation.
    o = jnp.dot(w2_ref[...], h.astype(jnp.bfloat16),
                preferred_element_type=jnp.float32)
    o_ref[...] = (o + b2_ref[...]).astype(o_ref.dtype)


def _pick_spatial_tile(S, n_batch, max_tile):
    """Largest lane-friendly tile: multiple of 128 dividing S when possible."""
    if S <= 128:
        return S                                  # full-extent block is legal
    cap = max(128, (min(max_tile, S) // 128) * 128)
    if n_batch == 1:
        # Guarantee >= 2 parallel grid steps so both v7x TensorCores get work.
        cap = min(cap, max(128, ((S // 2) // 128) * 128))
    for t in range(cap, 127, -128):
        if S % t == 0:
            return t
    return cap                                     # no exact divisor -> pad


# ------------------------------- JAX glue ----------------------------------

def init_params(key, in_features, hidden_features=None, out_features=None):
    """PyTorch Conv3d(k=1) init; weights kept in [Cout, Cin], biases [Cout, 1]."""
    out_features = out_features or in_features
    hidden_features = hidden_features or in_features
    k1, k2, k3, k4 = jax.random.split(key, 4)

    def conv_w(k, cout, cin):
        lim = 1.0 / jnp.sqrt(float(cin))
        return jax.random.uniform(k, (cout, cin), jnp.float32, -lim, lim)

    def conv_b(k, cout, cin):
        lim = 1.0 / jnp.sqrt(float(cin))
        return jax.random.uniform(k, (cout, 1), jnp.float32, -lim, lim)

    return dict(
        w1=conv_w(k1, hidden_features, in_features),
        b1=conv_b(k2, hidden_features, in_features),
        w2=conv_w(k3, out_features, hidden_features),
        b2=conv_b(k4, out_features, hidden_features),
    )


def cmlp_forward(x_ncdhw, params, *, spatial_tile=2048):
    """Fused CMlp forward (Dropout is identity: drop=0.0 / eval mode)."""
    N, Cin, D, H, W = x_ncdhw.shape
    Chid = params["w1"].shape[0]
    Cout = params["w2"].shape[0]
    S = D * H * W

    # NCDHW -> (N, C, S): a pure reshape (no transpose, no HBM round trip).
    x = x_ncdhw.reshape(N, Cin, S)

    t_s = _pick_spatial_tile(S, N, spatial_tile)
    n_s = pl.cdiv(S, t_s)
    Sp = n_s * t_s
    if Sp != S:
        # Fallback only when no multiple of 128 divides S.
        x = jnp.pad(x, ((0, 0), (0, 0), (0, Sp - S)))

    # bf16 weights for the MXU (tiny one-time cast; biases stay f32).
    w1 = params["w1"].astype(jnp.bfloat16)
    w2 = params["w2"].astype(jnp.bfloat16)
    b1 = params["b1"]
    b2 = params["b2"]

    y = pl.pallas_call(
        _cmlp_kernel,
        out_shape=jax.ShapeDtypeStruct((N, Cout, Sp), x.dtype),
        grid_spec=pltpu.PrefetchScalarGridSpec(
            num_scalar_prefetch=0,
            grid=(N, n_s),
            in_specs=[
                # Activations: batch dim squeezed, spatial tiled on lanes.
                pl.BlockSpec((None, Cin, t_s), lambda n, s: (n, 0, s)),
                # Weights/biases: constant index_map -> fetched once, resident.
                pl.BlockSpec((Chid, Cin), lambda n, s: (0, 0)),
                pl.BlockSpec((Chid, 1), lambda n, s: (0, 0)),
                pl.BlockSpec((Cout, Chid), lambda n, s: (0, 0)),
                pl.BlockSpec((Cout, 1), lambda n, s: (0, 0)),
            ],
            out_specs=pl.BlockSpec((None, Cout, t_s), lambda n, s: (n, 0, s)),
        ),
        compiler_params=pltpu.CompilerParams(
            dimension_semantics=("parallel", "parallel"),
            vmem_limit_bytes=48 * 1024 * 1024,   # fits v7x's 64 MiB physical VMEM
        ),
    )(x, w1, b1, w2, b2)

    if Sp != S:
        y = y[:, :, :S]
    return y.reshape(N, Cout, D, H, W)


def cmlp_reference(x_ncdhw, params):
    """Pure-JAX f32 reference (exact erf GELU, torch default) for validation."""
    N, Cin, D, H, W = x_ncdhw.shape
    x = x_ncdhw.reshape(N, Cin, -1)
    h = jnp.einsum("oc,ncs->nos", params["w1"], x,
                   precision=jax.lax.Precision.HIGHEST) + params["b1"][None]
    h = 0.5 * h * (1.0 + jax.lax.erf(h * _INV_SQRT2))
    y = jnp.einsum("oc,ncs->nos", params["w2"], h,
                   precision=jax.lax.Precision.HIGHEST) + params["b2"][None]
    return y.reshape(N, -1, D, H, W)


if __name__ == "__main__":
    key = jax.random.PRNGKey(0)
    kx, kp = jax.random.split(key)

    # Small CMlp config: in=32, hidden=128, out=32; NCDHW input, S = 4*8*8 = 256.
    N, Cin, Chid, Cout = 2, 32, 128, 32
    D, H, W = 4, 8, 8

    x = jax.random.normal(kx, (N, Cin, D, H, W), jnp.float32)
    params = init_params(kp, Cin, Chid, Cout)

    fwd = jax.jit(lambda inp: cmlp_forward(inp, params))
    out = fwd(x)
    jax.block_until_ready(out)

    assert out.shape == (N, Cout, D, H, W)
    assert bool(jnp.isfinite(out).all())

    # Tolerance covers bf16 MXU operands + tanh-approx GELU vs exact-erf f32 ref.
    ref = cmlp_reference(x, params)
    max_err = float(jnp.max(jnp.abs(out - ref)))
    assert jnp.allclose(out, ref, rtol=2e-2, atol=2e-2), max_err

    print("KERNEL_OK")
</pallas_src>

<mosaic_0001>
module attributes {stable_mosaic.version = 11 : i64} {
  func.func @_cmlp_kernel(%arg0: i32, %arg1: i32, %arg2: memref<1x32x256xf32, #tpu.memory_space<vmem>>, %arg3: memref<128x32xbf16, #tpu.memory_space<vmem>>, %arg4: memref<128x1xf32, #tpu.memory_space<vmem>>, %arg5: memref<32x128xbf16, #tpu.memory_space<vmem>>, %arg6: memref<32x1xf32, #tpu.memory_space<vmem>>, %arg7: memref<1x32x256xf32, #tpu.memory_space<vmem>>) attributes {dimension_semantics = [#tpu.dimension_semantics<parallel>, #tpu.dimension_semantics<parallel>], iteration_bounds = array<i64: 2, 1>, scalar_prefetch = 0 : i64, scratch_operands = 0 : i64, tpu.core_type = #tpu.core_type<tc>, window_params = [{transform_indices = @transform_0, window_bounds = array<i64: 1, 32, 256>}, {pipeline_mode = #tpu.pipeline_mode<synchronous>, transform_indices = @transform_1, window_bounds = array<i64: 128, 32>}, {pipeline_mode = #tpu.pipeline_mode<synchronous>, transform_indices = @transform_2, window_bounds = array<i64: 128, 1>}, {pipeline_mode = #tpu.pipeline_mode<synchronous>, transform_indices = @transform_3, window_bounds = array<i64: 32, 128>}, {pipeline_mode = #tpu.pipeline_mode<synchronous>, transform_indices = @transform_4, window_bounds = array<i64: 32, 1>}, {transform_indices = @transform_5, window_bounds = array<i64: 1, 32, 256>}]} {
    %c0 = arith.constant 0 : index
    %c0_0 = arith.constant 0 : index
    %c0_1 = arith.constant 0 : index
    %0 = vector.load %arg2[%c0, %c0_0, %c0_1] : memref<1x32x256xf32, #tpu.memory_space<vmem>>, vector<1x32x256xf32>
    %1 = vector.shape_cast %0 : vector<1x32x256xf32> to vector<32x256xf32>
    %2 = arith.truncf %1 : vector<32x256xf32> to vector<32x256xbf16>
    %c0_2 = arith.constant 0 : index
    %c0_3 = arith.constant 0 : index
    %3 = vector.load %arg3[%c0_2, %c0_3] : memref<128x32xbf16, #tpu.memory_space<vmem>>, vector<128x32xbf16>
    %cst = arith.constant dense<0.000000e+00> : vector<128x256xf32>
    %4 = tpu.matmul %3, %2, %cst {dimension_numbers = #tpu.dot_dimension_numbers<[1], [0], [0], [1], [0, 0, 1, 1], [], []>} : vector<128x32xbf16>, vector<32x256xbf16>, vector<128x256xf32> -> vector<128x256xf32>
    %c0_4 = arith.constant 0 : index
    %c0_5 = arith.constant 0 : index
    %5 = vector.load %arg4[%c0_4, %c0_5] : memref<128x1xf32, #tpu.memory_space<vmem>>, vector<128x1xf32>
    %6 = vector.broadcast %5 : vector<128x1xf32> to vector<128x256xf32>
    %7 = arith.addf %4, %6 : vector<128x256xf32>
    %cst_6 = arith.constant 5.000000e-01 : f32
    %8 = vector.broadcast %cst_6 : f32 to vector<128x256xf32>
    %9 = arith.mulf %8, %7 : vector<128x256xf32>
    %cst_7 = arith.constant 4.471500e-02 : f32
    %10 = vector.broadcast %cst_7 : f32 to vector<128x256xf32>
    %11 = arith.mulf %10, %7 : vector<128x256xf32>
    %12 = arith.mulf %11, %7 : vector<128x256xf32>
    %13 = arith.mulf %12, %7 : vector<128x256xf32>
    %14 = arith.addf %7, %13 : vector<128x256xf32>
    %cst_8 = arith.constant 0.797884583 : f32
    %15 = vector.broadcast %cst_8 : f32 to vector<128x256xf32>
    %16 = arith.mulf %15, %14 : vector<128x256xf32>
    %17 = math.tanh %16 : vector<128x256xf32>
    %cst_9 = arith.constant 1.000000e+00 : f32
    %18 = vector.broadcast %cst_9 : f32 to vector<128x256xf32>
    %19 = arith.addf %18, %17 : vector<128x256xf32>
    %20 = arith.mulf %9, %19 : vector<128x256xf32>
    %c0_10 = arith.constant 0 : index
    %c0_11 = arith.constant 0 : index
    %21 = vector.load %arg5[%c0_10, %c0_11] : memref<32x128xbf16, #tpu.memory_space<vmem>>, vector<32x128xbf16>
    %22 = arith.truncf %20 : vector<128x256xf32> to vector<128x256xbf16>
    %cst_12 = arith.constant dense<0.000000e+00> : vector<32x256xf32>
    %23 = tpu.matmul %21, %22, %cst_12 {dimension_numbers = #tpu.dot_dimension_numbers<[1], [0], [0], [1], [0, 0, 1, 1], [], []>} : vector<32x128xbf16>, vector<128x256xbf16>, vector<32x256xf32> -> vector<32x256xf32>
    %c0_13 = arith.constant 0 : index
    %c0_14 = arith.constant 0 : index
    %24 = vector.load %arg6[%c0_13, %c0_14] : memref<32x1xf32, #tpu.memory_space<vmem>>, vector<32x1xf32>
    %25 = vector.broadcast %24 : vector<32x1xf32> to vector<32x256xf32>
    %26 = arith.addf %23, %25 : vector<32x256xf32>
    %c0_15 = arith.constant 0 : index
    %c0_16 = arith.constant 0 : index
    %c0_17 = arith.constant 0 : index
    %27 = vector.load %arg7[%c0_15, %c0_16, %c0_17] : memref<1x32x256xf32, #tpu.memory_space<vmem>>, vector<1x32x256xf32>
    %28 = vector.shape_cast %27 : vector<1x32x256xf32> to vector<32x256xf32>
    %29 = vector.shape_cast %26 : vector<32x256xf32> to vector<1x32x256xf32>
    tpu.vector_store %arg7[%c0_15, %c0_16, %c0_17], %29 {strides = array<i32>} : memref<1x32x256xf32, #tpu.memory_space<vmem>>, vector<1x32x256xf32>,
    return
  }
  func.func @transform_0(%arg0: i32, %arg1: i32) -> (i32, i32, i32) {
    %c0_i32 = arith.constant 0 : i32
    %c0_i32_0 = arith.constant 0 : i32
    return %arg0, %c0_i32, %arg1 : i32, i32, i32
  }
  func.func @transform_1(%arg0: i32, %arg1: i32) -> (i32, i32) {
    %c0_i32 = arith.constant 0 : i32
    %c0_i32_0 = arith.constant 0 : i32
    %c0_i32_1 = arith.constant 0 : i32
    return %c0_i32, %c0_i32_0 : i32, i32
  }
  func.func @transform_2(%arg0: i32, %arg1: i32) -> (i32, i32) {
    %c0_i32 = arith.constant 0 : i32
    %c0_i32_0 = arith.constant 0 : i32
    %c0_i32_1 = arith.constant 0 : i32
    return %c0_i32, %c0_i32_0 : i32, i32
  }
  func.func @transform_3(%arg0: i32, %arg1: i32) -> (i32, i32) {
    %c0_i32 = arith.constant 0 : i32
    %c0_i32_0 = arith.constant 0 : i32
    %c0_i32_1 = arith.constant 0 : i32
    return %c0_i32, %c0_i32_0 : i32, i32
  }
  func.func @transform_4(%arg0: i32, %arg1: i32) -> (i32, i32) {
    %c0_i32 = arith.constant 0 : i32
    %c0_i32_0 = arith.constant 0 : i32
    %c0_i32_1 = arith.constant 0 : i32
    return %c0_i32, %c0_i32_0 : i32, i32
  }
  func.func @transform_5(%arg0: i32, %arg1: i32) -> (i32, i32, i32) {
    %c0_i32 = arith.constant 0 : i32
    %c0_i32_0 = arith.constant 0 : i32
    return %arg0, %c0_i32, %arg1 : i32, i32, i32
  }
}

</mosaic_0001>

<bundles_post_ra>
// kernel: _lambda_.1
= control target key start
LH: loop header
LB: loop body
LE: loop exit
PB: predicated region body
PF: predicated region fallthrough
CT: control target
= control target key end

     0   :  { %s1246_s18 = smov 0   ;;  %s1248_s19 = smov 0   ;;  %s1652_s0 = inlined_call_operand.vmem [shape: f32[2,32,256], index: 0, kind: input, shape index: {}]   ;;  %s1653_s1 = inlined_call_operand.vmem [shape: bf16[128,32], index: 1, kind: input, shape index: {}]   ;;  %s1654_s2 = inlined_call_operand.vmem [shape: f32[128,1], index: 2, kind: input, shape index: {}]   ;;  %s1655_s3 = inlined_call_operand.vmem [shape: bf16[32,128], index: 3, kind: input, shape index: {}]   ;;  %s1656_s4 = inlined_call_operand.vmem [shape: f32[32,1], index: 4, kind: input, shape index: {}]   ;;  %s1657_s5 = inlined_call_operand.vmem [shape: f32[2,32,256], index: 5, kind: output, shape index: {}]  }
   0x1   :  { %s1250_s20 = smov 0  }
   0x2 LB: > { %s27_s21 = sadd.s32 1, %s1209_s19  ;;  %p1063_p0 = scmp.ge.s32.totalorder %s1213_s20, 1  ;;  %s1213_s20 = sphi %s1250_s20, %s15_s20   ;;  %s1209_s19 = sphi %s1248_s19, %s1659_s19   ;;  %s1205_s18 = sphi %s1246_s18, %s1658_s18  }
   0x3   : > { %p29_p1 = scmp.ge.s32.totalorder %s27_s21, 2  ;;  %p208_p2 = scmp.lt.s32.totalorder %s1213_s20, 3 }
   0x5   : > { %s1661_s21 = smov (%p29_p1, %s27_s21), 0  ;;  %p209_p3 = pnand %p1063_p0, %p208_p2 }
   0x6   : > { %p245_p4 = scmp.lt.s32.totalorder (!%p209_p3), %s1205_s18, 1  ;;  %v1215_v0 = vmov (!%p209_p3), 0   ;;  %v293_v13 = vld [vmem:[%s1654_s2] sm:$0xff] (!%p209_p3)  ;;  %v295_v14 = vld [vmem:[%s1654_s2 + $0x10] sm:$0xff] (!%p209_p3)  ;;  %v294_v16 = vld [vmem:[%s1654_s2 + $0x8] sm:$0xff] (!%p209_p3)  ;;  %vm429_vm0 = vcmask (!%p209_p3), 261120  }
   0x7   : > { %212 = sbr.rel (%p209_p3) target bundleno = 565 (0x235), region = 40  ;;  %486 = vmatprep.mubr.bf16.mxu0 (!%p209_p3), %v1215_v0  ;;  %1115 = vset.pattern.permute.xlu0 (!%p209_p3), %v1215_v0  ;;  %v1117_v15 = vld [vmem:[%s1653_s1] sm:$0xff] (!%p209_p3)   ;;  %v296_v17 = vld [vmem:[%s1654_s2 + $0x18] sm:$0xff] (!%p209_p3)  ;;  %v298_v19 = vld [vmem:[%s1654_s2 + $0x28] sm:$0xff] (!%p209_p3) }
   0x8   : > { %1116 = vset.pattern.permute.xlu1 (!%p209_p3), %v1215_v0  ;;  %943 = vmatprep.mubr.bf16.mxu1 (!%p209_p3), %v1215_v0  ;;  %v297_v18 = vld [vmem:[%s1654_s2 + $0x20] sm:$0xff] (!%p209_p3)  ;;  %v1118_v20 = vld [vmem:[%s1653_s1 + $0x8] sm:$0xff] (!%p209_p3)   ;;  %v299_v21 = vld [vmem:[%s1654_s2 + $0x30] sm:$0xff] (!%p209_p3) }
   0x9   : > { %311 = vperm.xlu0 (!%p209_p3), %1115, %v293_v13   ;;  %321 = vperm.xlu1 (!%p209_p3), %1116, %v295_v14   ;;  %v300_v22 = vld [vmem:[%s1654_s2 + $0x38] sm:$0xff] (!%p209_p3)  ;;  %v301_v23 = vld [vmem:[%s1654_s2 + $0x40] sm:$0xff] (!%p209_p3)  ;;  %v302_v24 = vld [vmem:[%s1654_s2 + $0x48] sm:$0xff] (!%p209_p3) }
   0xa   : > { %v1119_v25 = vld [vmem:[%s1653_s1 + $0x10] sm:$0xff] (!%p209_p3)   ;;  %v304_v27 = vld [vmem:[%s1654_s2 + $0x58] sm:$0xff] (!%p209_p3)  ;;  %v305_v28 = vld [vmem:[%s1654_s2 + $0x60] sm:$0xff] (!%p209_p3) }
   0xb   : > { %v303_v26 = vld [vmem:[%s1654_s2 + $0x50] sm:$0xff] (!%p209_p3)  ;;  %v306_v29 = vld [vmem:[%s1654_s2 + $0x68] sm:$0xff] (!%p209_p3)  ;;  %v1120_v30 = vld [vmem:[%s1653_s1 + $0x18] sm:$0xff] (!%p209_p3)  }
   0xc   : > { %v307_v31 = vld [vmem:[%s1654_s2 + $0x70] sm:$0xff] (!%p209_p3)  ;;  %v308_v32 = vld [vmem:[%s1654_s2 + $0x78] sm:$0xff] (!%p209_p3)  ;;  %v875_v33 = vld [vmem:[%s1656_s4] sm:$0xff] (!%p209_p3) }
   0xd   : > { %316 = vperm.xlu0 (!%p209_p3), %1115, %v294_v16   ;;  %326 = vperm.xlu1 (!%p209_p3), %1116, %v296_v17   ;;  %v876_v34 = vld [vmem:[%s1656_s4 + $0x8] sm:$0xff] (!%p209_p3)  ;;  %v1121_v35 = vld [vmem:[%s1653_s1 + $0x20] sm:$0xff] (!%p209_p3)   ;;  %v877_v36 = vld [vmem:[%s1656_s4 + $0x10] sm:$0xff] (!%p209_p3) }
   0xe   : > { %s1663_s18 = smov (!%p245_p4, %s1205_s18), 1  ;;  %v878_v37 = vld [vmem:[%s1656_s4 + $0x18] sm:$0xff]  ;;  %v1122_v38 = vld [vmem:[%s1653_s1 + $0x28] sm:$0xff]   ;;  %v1123_v39 = vld [vmem:[%s1653_s1 + $0x30] sm:$0xff]  }
   0xf   : > { %s1088_s22 = sshll.u32 %s1663_s18, 6  ;;  %v1124_v40 = vld [vmem:[%s1653_s1 + $0x38] sm:$0xff]  }
  0x10   : > { %s252_s25 = scalar_lea.vmem %s1652_s0, %s1088_s22  ;;  %s262_s28 = scalar_lea.vmem %s1657_s5, %s1088_s22 }
  0x11   : > { %v266_v1 = vld [vmem:[%s252_s25 + $0x8] sm:$0xff]  ;;  %v268_v2 = vld [vmem:[%s252_s25 + $0x18] sm:$0xff]  ;;  %v265_v3 = vld [vmem:[%s252_s25] sm:$0xff]  ;;  %331 = vperm.xlu0 %1115, %v297_v18   ;;  %336 = vperm.xlu1 %1116, %v298_v19  }
  0x12   : > { %v274_v4 = vpack.c.bf16 %v268_v2, %v266_v1  ;;  %v267_v5 = vld [vmem:[%s252_s25 + $0x10] sm:$0xff]  ;;  %v270_v6 = vld [vmem:[%s252_s25 + $0x28] sm:$0xff]  ;;  %v272_v7 = vld [vmem:[%s252_s25 + $0x38] sm:$0xff] }
  0x13   : > { %v273_v8 = vpack.c.bf16 %v267_v5, %v265_v3  ;;  %v276_v9 = vpack.c.bf16 %v272_v7, %v270_v6  ;;  %v269_v10 = vld [vmem:[%s252_s25 + $0x20] sm:$0xff]  ;;  %v271_v11 = vld [vmem:[%s252_s25 + $0x30] sm:$0xff] }
  0x14   : > { %454 = vmatprep.subr.bf16.mxu0 %v274_v4  ;;  %v275_v12 = vpack.c.bf16 %v271_v11, %v269_v10 }
  0x15   : > { %455 = vmatpush1.bf16.msra.mxu0 %v273_v8  ;;  %341 = vperm.xlu0 %1115, %v299_v21  }
  0x16   : > { %456 = vmatprep.subr.bf16.mxu0 %v276_v9  ;;  %346 = vperm.xlu1 %1116, %v300_v22  }
  0x19   : > { %457 = vmatpush1.bf16.msra.mxu0 %v275_v12  ;;  %351 = vperm.xlu0 %1115, %v301_v23  }
  0x1a   : > { %356 = vperm.xlu1 %1116, %v302_v24  }
  0x1c   : > { %1076 = vmatmul.mubr.msk.bf16.vlgmr.msra.gmra.mrb[0].mxu0 %vm429_vm0, %v1117_v15 }
  0x1d   : > { %496 = vmatprep.mubr.bf16.mxu0 %v1215_v0  ;;  %361 = vperm.xlu0 %1115, %v303_v26  }
  0x1e   : > { %366 = vperm.xlu1 %1116, %v304_v27  }
  0x21   : > { %371 = vperm.xlu0 %1115, %v305_v28  }
  0x22   : > { %376 = vperm.xlu1 %1116, %v306_v29  }
  0x24   : > { %1077 = vmatmul.mubr.msk.bf16.gmra.mrb[4].mxu0 %vm429_vm0, %v1118_v20 }
  0x25   : > { %506 = vmatprep.mubr.bf16.mxu0 %v1215_v0  ;;  %381 = vperm.xlu0 %1115, %v307_v31  }
  0x26   : > { %386 = vperm.xlu1 %1116, %v308_v32  }
  0x29   : > { %881 = vperm.xlu0 %1115, %v875_v33  }
  0x2a   : > { %886 = vperm.xlu1 %1116, %v876_v34  }
  0x2c   : > { %1078 = vmatmul.mubr.msk.bf16.gmra.mrb[8].mxu0 %vm429_vm0, %v1119_v25 }
  0x2d   : > { %516 = vmatprep.mubr.bf16.mxu0 %v1215_v0  ;;  %891 = vperm.xlu0 %1115, %v877_v36  }
  0x2e   : > { %896 = vperm.xlu1 %1116, %v878_v37  }
  0x34   : > { %1079 = vmatmul.mubr.msk.bf16.gmra.mrb[12].mxu0 %vm429_vm0, %v1120_v30 }
  0x35   : > { %526 = vmatprep.mubr.bf16.mxu0 %v1215_v0 }
  0x3c   : > { %1080 = vmatmul.mubr.msk.bf16.gmra.mrb[16].mxu0 %vm429_vm0, %v1121_v35 }
  0x3d   : > { %536 = vmatprep.mubr.bf16.mxu0 %v1215_v0 }
  0x44   : > { %1081 = vmatmul.mubr.msk.bf16.gmra.mrb[20].mxu0 %vm429_vm0, %v1122_v38 }
  0x45   : > { %546 = vmatprep.mubr.bf16.mxu0 %v1215_v0 }
  0x4c   : > { %1082 = vmatmul.mubr.msk.bf16.gmra.mrb[24].mxu0 %vm429_vm0, %v1123_v39 }
  0x4d   : > { %556 = vmatprep.mubr.bf16.mxu0 %v1215_v0 }
  0x54   : > { %1083 = vmatmul.mubr.msk.bf16.gmra.mrb[28].mxu0 %vm429_vm0, %v1124_v40 }
  0x88   : > { %v312_v41 = vpop.permute.xlu0 %311  ;;  %v322_v51 = vpop.permute.xlu1 %321 }
  0x8c   : > { %v317_v45 = vpop.permute.xlu0 %316  ;;  %v327_v4 = vpop.permute.xlu1 %326 }
  0x90   : > { %v332_v29 = vpop.permute.xlu0 %331  ;;  %v337_v37 = vpop.permute.xlu1 %336 }
  0xef   : > { %v488_v42 = vpop.f32.mrb[0].mxu0 }
  0xf0   : > { %v1375_v43 = vadd.f32 %v488_v42, %v312_v41  ;;  %v490_v44 = vpop.f32.mrb[1].mxu0 }
  0xf1   : > { %v1377_v46 = vadd.f32 %v490_v44, %v312_v41  ;;  %v492_v47 = vpop.f32.mrb[2].mxu0 }
  0xf2   : > { %v599_v48 = vmul.f32 0.044715, %v1375_v43  ;;  %v1380_v49 = vadd.f32 %v492_v47, %v317_v45  ;;  %v494_v50 = vpop.f32.mrb[3].mxu0  ;;  %v567_v40 = vmul.f32 0.5, %v1375_v43 }
  0xf3   : > { %v600_v52 = vmul.f32 0.044715, %v1377_v46  ;;  %v1383_v53 = vadd.f32 %v494_v50, %v317_v45  ;;  %v568_v50 = vmul.f32 0.5, %v1377_v46 }
  0xf4   : > { %v631_v54 = vmul.f32 %v599_v48, %v1375_v43  ;;  %v601_v55 = vmul.f32 0.044715, %v1380_v49 }
  0xf5   : > { %v602_v56 = vmul.f32 0.044715, %v1383_v53  ;;  %v632_v57 = vmul.f32 %v600_v52, %v1377_v46 }
  0xf6   : > { %v633_v58 = vmul.f32 %v601_v55, %v1380_v49  ;;  %v663_v59 = vmul.f32 %v631_v54, %v1375_v43 }
  0xf7   : > { %v498_v60 = vpop.f32.mrb[4].mxu0  ;;  %v634_v61 = vmul.f32 %v602_v56, %v1383_v53  ;;  %v664_v62 = vmul.f32 %v632_v57, %v1377_v46  ;;  %v570_v57 = vmul.f32 0.5, %v1383_v53 }
  0xf8   : > { %v1393_v63 = vadd.f32 %v498_v60, %v322_v51  ;;  %v500_v1 = vpop.f32.mrb[5].mxu0  ;;  %v665_v2 = vmul.f32 %v633_v58, %v1380_v49  ;;  %v695_v3 = vadd.f32 %v663_v59, %v1375_v43  ;;  %v569_v58 = vmul.f32 0.5, %v1380_v49 }
  0xf9   : > { %v501_v5 = vadd.f32 %v500_v1, %v322_v51  ;;  %v502_v6 = vpop.f32.mrb[6].mxu0  ;;  %v666_v7 = vmul.f32 %v634_v61, %v1383_v53  ;;  %v696_v8 = vadd.f32 %v664_v62, %v1377_v46 }
  0xfa   : > { %v603_v9 = vmul.f32 0.044715, %v1393_v63  ;;  %v1400_v10 = vadd.f32 %v502_v6, %v327_v4  ;;  %v504_v11 = vpop.f32.mrb[7].mxu0  ;;  %v697_v12 = vadd.f32 %v665_v2, %v1380_v49  ;;  %v727_v13 = vmul.f32 0.7978846, %v695_v3  ;;  %v342_v3 = vpop.permute.xlu0 %341 }
  0xfb   : > { %v604_v14 = vmul.f32 0.044715, %v501_v5  ;;  %v1403_v15 = vadd.f32 %v504_v11, %v327_v4  ;;  %v698_v16 = vadd.f32 %v666_v7, %v1383_v53  ;;  %v728_v17 = vmul.f32 0.7978846, %v696_v8 }
  0xfc   : > { %v635_v18 = vmul.f32 %v603_v9, %v1393_v63  ;;  %v605_v19 = vmul.f32 0.044715, %v1400_v10  ;;  %v729_v20 = vmul.f32 0.7978846, %v697_v12  ;;  %1127 = vtanh.f32 %v727_v13  ;;  %v347_v13 = vpop.permute.xlu1 %346 }
  0xfd   : > { %v636_v21 = vmul.f32 %v604_v14, %v501_v5  ;;  %v606_v22 = vmul.f32 0.044715, %v1403_v15  ;;  %v730_v23 = vmul.f32 0.7978846, %v698_v16  ;;  %1129 = vtanh.f32 %v728_v17 }
  0xfe   : > { %v667_v24 = vmul.f32 %v635_v18, %v1393_v63  ;;  %v637_v25 = vmul.f32 %v605_v19, %v1400_v10  ;;  %1131 = vtanh.f32 %v729_v20  ;;  %v1432_v59 = vmul.f32 0.5, %v501_v5 }
  0xff   : > { %v668_v26 = vmul.f32 %v636_v21, %v501_v5  ;;  %v638_v27 = vmul.f32 %v606_v22, %v1403_v15  ;;  %v508_v28 = vpop.f32.mrb[8].mxu0  ;;  %1133 = vtanh.f32 %v730_v23  ;;  %v574_v12 = vmul.f32 0.5, %v1403_v15 }
 0x100   : > { %v669_v30 = vmul.f32 %v637_v25, %v1400_v10  ;;  %v510_v31 = vpop.f32.mrb[9].mxu0  ;;  %v699_v36 = vadd.f32 %v667_v24, %v1393_v63  ;;  %v1417_v38 = vadd.f32 %v508_v28, %v332_v29  ;;  %v571_v18 = vmul.f32 0.5, %v1393_v63 }
 0x101   : > { %v670_v32 = vmul.f32 %v638_v27, %v1403_v15  ;;  %v1414_v33 = vadd.f32 %v510_v31, %v332_v29  ;;  %v512_v34 = vpop.f32.mrb[10].mxu0  ;;  %v700_v35 = vadd.f32 %v668_v26, %v501_v5  ;;  %v573_v19 = vmul.f32 0.5, %v1400_v10 }
 0x102   : > { %v514_v39 = vpop.f32.mrb[11].mxu0  ;;  %v701_v41 = vadd.f32 %v669_v30, %v1400_v10  ;;  %v1425_v48 = vadd.f32 %v512_v34, %v337_v37  ;;  %v731_v51 = vmul.f32 0.7978846, %v699_v36  ;;  %v607_v61 = vmul.f32 0.044715, %v1417_v38 }
 0x103   : > { %v608_v42 = vmul.f32 0.044715, %v1414_v33  ;;  %v1422_v44 = vadd.f32 %v514_v39, %v337_v37  ;;  %v702_v45 = vadd.f32 %v670_v32, %v1403_v15  ;;  %v732_v47 = vmul.f32 0.7978846, %v700_v35  ;;  %v352_v35 = vpop.permute.xlu0 %351 }
 0x104   : > { %v733_v52 = vmul.f32 0.7978846, %v701_v41  ;;  %v609_v6 = vmul.f32 0.044715, %v1425_v48  ;;  %v639_v20 = vmul.f32 %v607_v61, %v1417_v38  ;;  %v1454_v63 = vmul.f32 0.5, %v1417_v38 }
 0x105   : > { %v640_v54 = vmul.f32 %v608_v42, %v1414_v33  ;;  %v610_v55 = vmul.f32 0.044715, %v1422_v44  ;;  %v734_v43 = vmul.f32 0.7978846, %v702_v45  ;;  %1135 = vtanh.f32 %v732_v47 }
 0x106   : > { %v1128_v56 = vpop.eup %1127  ;;  %1137 = vtanh.f32 %v731_v51  ;;  %v641_v24 = vmul.f32 %v609_v6, %v1425_v48  ;;  %v671_v36 = vmul.f32 %v639_v20, %v1417_v38 }
 0x107   : > { %v1130_v60 = vpop.eup %1129  ;;  %v642_v46 = vmul.f32 %v610_v55, %v1422_v44  ;;  %v518_v62 = vpop.f32.mrb[12].mxu0  ;;  %v791_v1 = vadd.f32 1.0, %v1128_v56  ;;  %1139 = vtanh.f32 %v734_v43  ;;  %v672_v4 = vmul.f32 %v640_v54, %v1414_v33 }
 0x108   : > { %v1132_v2 = vpop.eup %1131  ;;  %v520_v53 = vpop.f32.mrb[13].mxu0  ;;  %v792_v7 = vadd.f32 1.0, %v1130_v60  ;;  %1141 = vtanh.f32 %v733_v52  ;;  %v1439_v8 = vadd.f32 %v518_v62, %v342_v3  ;;  %v673_v45 = vmul.f32 %v641_v24, %v1425_v48 }
 0x109   : > { %v1134_v49 = vpop.eup %1133  ;;  %v674_v5 = vmul.f32 %v642_v46, %v1422_v44  ;;  %v522_v9 = vpop.f32.mrb[14].mxu0  ;;  %v793_v11 = vadd.f32 1.0, %v1132_v2  ;;  %v1442_v14 = vadd.f32 %v520_v53, %v342_v3  ;;  %v823_v22 = vmul.f32 %v791_v1, %v567_v40 }
 0x10a   : > { %v524_v16 = vpop.f32.mrb[15].mxu0  ;;  %v794_v17 = vadd.f32 1.0, %v1134_v49  ;;  %v824_v25 = vmul.f32 %v792_v7, %v568_v50  ;;  %v704_v15 = vadd.f32 %v672_v4, %v1414_v33  ;;  %v611_v27 = vmul.f32 0.044715, %v1439_v8 }
 0x10b   : > { %v1447_v21 = vadd.f32 %v524_v16, %v347_v13  ;;  %v825_v23 = vmul.f32 %v793_v11, %v569_v58  ;;  %v706_v29 = vadd.f32 %v674_v5, %v1422_v44  ;;  %v612_v10 = vmul.f32 0.044715, %v1442_v14 }
 0x10c   : > { %v826_v26 = vmul.f32 %v794_v17, %v570_v57  ;;  %v736_v32 = vmul.f32 0.7978846, %v704_v15  ;;  %v1459_v37 = vadd.f32 %v522_v9, %v347_v13  ;;  %v1462_v40 = vmul.f32 0.5, %v1414_v33  ;;  %v357_v57 = vpop.permute.xlu1 %356 }
 0x10d   : > { %v859_v28 = vpack.c.bf16 %v825_v23, %v823_v22  ;;  %v614_v30 = vmul.f32 0.044715, %v1447_v21  ;;  %v738_v41 = vmul.f32 0.7978846, %v706_v29  ;;  %v1470_v56 = vmul.f32 0.5, %v1422_v44  ;;  %v362_v22 = vpop.permute.xlu0 %361 }
 0x10e   : > { %v860_v31 = vpack.c.bf16 %v826_v26, %v824_v25  ;;  %1143 = vtanh.f32 %v736_v32  ;;  %v643_v58 = vmul.f32 %v611_v27, %v1439_v8  ;;  %v644_v60 = vmul.f32 %v612_v10, %v1442_v14 }
 0x10f   : > { %v1136_v34 = vpop.eup %1135  ;;  %v528_v39 = vpop.f32.mrb[16].mxu0  ;;  %1145 = vtanh.f32 %v738_v41  ;;  %v646_v61 = vmul.f32 %v614_v30, %v1447_v21  ;;  %v613_v1 = vmul.f32 0.044715, %v1459_v37  ;;  %v703_v7 = vadd.f32 %v671_v36, %v1417_v38 }
 0x110   : > { %v1138_v42 = vpop.eup %1137  ;;  %v1465_v47 = vadd.f32 %v528_v39, %v352_v35  ;;  %v530_v50 = vpop.f32.mrb[17].mxu0  ;;  %911 = vmatprep.subr.bf16.mxu1 %v860_v31  ;;  %v796_v51 = vadd.f32 1.0, %v1136_v34  ;;  %v705_v11 = vadd.f32 %v673_v45, %v1425_v48  ;;  %v676_v13 = vmul.f32 %v644_v60, %v1442_v14 }
 0x111   : > { %v1140_v52 = vpop.eup %1139  ;;  %v1467_v54 = vadd.f32 %v530_v50, %v352_v35  ;;  %v532_v55 = vpop.f32.mrb[18].mxu0  ;;  %912 = vmatpush1.bf16.msra.mxu1 %v859_v28  ;;  %v795_v43 = vadd.f32 1.0, %v1138_v42  ;;  %v678_v16 = vmul.f32 %v646_v61, %v1447_v21  ;;  %v735_v20 = vmul.f32 0.7978846, %v703_v7 }
 0x112   : > { %v1142_v33 = vpop.eup %1141  ;;  %v534_v46 = vpop.f32.mrb[19].mxu0  ;;  %v798_v62 = vadd.f32 1.0, %v1140_v52  ;;  %v615_v2 = vmul.f32 0.044715, %v1465_v47  ;;  %v1477_v3 = vadd.f32 %v532_v55, %v357_v57  ;;  %v828_v6 = vmul.f32 %v796_v51, %v1432_v59 }
 0x113   : > { %v797_v4 = vadd.f32 1.0, %v1142_v33  ;;  %v1479_v44 = vadd.f32 %v534_v46, %v357_v57  ;;  %v616_v49 = vmul.f32 0.044715, %v1467_v54  ;;  %v827_v5 = vmul.f32 %v795_v43, %v571_v18  ;;  %v367_v15 = vpop.permute.xlu1 %366 }
 0x114   : > { %v830_v53 = vmul.f32 %v798_v62, %v574_v12  ;;  %v645_v23 = vmul.f32 %v613_v1, %v1459_v37  ;;  %v617_v59 = vmul.f32 0.044715, %v1477_v3  ;;  %v737_v38 = vmul.f32 0.7978846, %v705_v11 }
 0x115   : > { %v829_v9 = vmul.f32 %v797_v4, %v573_v19  ;;  %v675_v25 = vmul.f32 %v643_v58, %v1439_v8  ;;  %v618_v18 = vmul.f32 0.044715, %v1479_v44  ;;  %1147 = vtanh.f32 %v735_v20 }
 0x116   : > { %v862_v17 = vpack.c.bf16 %v830_v53, %v828_v6  ;;  %v647_v27 = vmul.f32 %v615_v2, %v1465_v47  ;;  %v648_v28 = vmul.f32 %v616_v49, %v1467_v54  ;;  %1149 = vtanh.f32 %v737_v38  ;;  %v372_v6 = vpop.permute.xlu0 %371 }
 0x117   : > { %v538_v12 = vpop.f32.mrb[20].mxu0  ;;  %v861_v24 = vpack.c.bf16 %v829_v9, %v827_v5  ;;  %v577_v34 = vmul.f32 0.5, %v1425_v48  ;;  %v708_v35 = vadd.f32 %v676_v13, %v1442_v14  ;;  %v710_v36 = vadd.f32 %v678_v16, %v1447_v21 }
 0x118   : > { %v1491_v19 = vadd.f32 %v538_v12, %v362_v22  ;;  %v540_v26 = vpop.f32.mrb[21].mxu0  ;;  %913 = vmatprep.subr.bf16.mxu1 %v862_v17  ;;  %v1144_v30 = vpop.eup %1143  ;;  %v677_v41 = vmul.f32 %v645_v23, %v1459_v37  ;;  %v649_v42 = vmul.f32 %v617_v59, %v1477_v3  ;;  %v650_v51 = vmul.f32 %v618_v18, %v1479_v44 }
 0x119   : > { %v1495_v29 = vadd.f32 %v540_v26, %v362_v22  ;;  %v542_v10 = vpop.f32.mrb[22].mxu0  ;;  %914 = vmatpush1.bf16.msra.mxu1 %v861_v24  ;;  %v1146_v39 = vpop.eup %1145  ;;  %v800_v50 = vadd.f32 1.0, %v1144_v30  ;;  %v740_v43 = vmul.f32 0.7978846, %v708_v35  ;;  %v1509_v48 = vmul.f32 %v647_v27, %v1465_v47 }
 0x11a   : > { %v1497_v31 = vadd.f32 %v542_v10, %v367_v15  ;;  %v544_v32 = vpop.f32.mrb[23].mxu0  ;;  %v619_v52 = vmul.f32 0.044715, %v1491_v19  ;;  %v802_v55 = vadd.f32 1.0, %v1146_v39  ;;  %v680_v33 = vmul.f32 %v648_v28, %v1467_v54  ;;  %v377_v17 = vpop.permute.xlu1 %376 }
 0x11b   : > { %v1504_v45 = vadd.f32 %v544_v32, %v367_v15  ;;  %v620_v57 = vmul.f32 0.044715, %v1495_v29  ;;  %v742_v58 = vmul.f32 0.7978846, %v710_v36  ;;  %v832_v61 = vmul.f32 %v800_v50, %v1462_v40 }
 0x11c   : > { %v621_v60 = vmul.f32 0.044715, %v1497_v31  ;;  %v834_v46 = vmul.f32 %v802_v55, %v1470_v56  ;;  %1151 = vtanh.f32 %v740_v43  ;;  %v1517_v62 = vmul.f32 %v649_v42, %v1477_v3 }
 0x11d   : > { %v622_v1 = vmul.f32 0.044715, %v1504_v45  ;;  %v1521_v4 = vmul.f32 0.5, %v1442_v14  ;;  %1153 = vtanh.f32 %v742_v58  ;;  %v682_v53 = vmul.f32 %v650_v51, %v1479_v44 }
 0x11e   : > { %v651_v7 = vmul.f32 %v619_v52, %v1491_v19  ;;  %v864_v40 = vpack.c.bf16 %v834_v46, %v832_v61  ;;  %v707_v56 = vadd.f32 %v675_v25, %v1439_v8  ;;  %v652_v5 = vmul.f32 %v620_v57, %v1495_v29  ;;  %v382_v52 = vpop.permute.xlu0 %381 }
 0x11f   : > { %v548_v2 = vpop.f32.mrb[24].mxu0  ;;  %v582_v13 = vmul.f32 0.5, %v1447_v21  ;;  %v709_v14 = vadd.f32 %v677_v41, %v1459_v37  ;;  %v1148_v16 = vpop.eup %1147  ;;  %v653_v20 = vmul.f32 %v621_v60, %v1497_v31  ;;  %v1535_v59 = vmul.f32 0.5, %v1439_v8 }
 0x120   : > { %v550_v49 = vpop.f32.mrb[25].mxu0  ;;  %v1527_v9 = vadd.f32 %v548_v2, %v372_v6  ;;  %915 = vmatprep.subr.bf16.mxu1 %v864_v40  ;;  %v739_v12 = vmul.f32 0.7978846, %v707_v56  ;;  %v1150_v24 = vpop.eup %1149  ;;  %v654_v38 = vmul.f32 %v622_v1, %v1504_v45  ;;  %v799_v21 = vadd.f32 1.0, %v1148_v16 }
 0x121   : > { %v552_v11 = vpop.f32.mrb[26].mxu0  ;;  %v1532_v22 = vadd.f32 %v550_v49, %v372_v6  ;;  %v741_v18 = vmul.f32 0.7978846, %v709_v14  ;;  %v1541_v26 = vmul.f32 %v651_v7, %v1491_v19  ;;  %v801_v15 = vadd.f32 1.0, %v1150_v24  ;;  %v387_v2 = vpop.permute.xlu1 %386 }
 0x122   : > { %v554_v23 = vpop.f32.mrb[27].mxu0  ;;  %v1538_v25 = vadd.f32 %v552_v11, %v377_v17  ;;  %1155 = vtanh.f32 %v739_v12  ;;  %v1546_v28 = vmul.f32 %v652_v5, %v1495_v29  ;;  %v623_v8 = vmul.f32 0.044715, %v1527_v9 }
 0x123   : > { %v1543_v27 = vadd.f32 %v554_v23, %v377_v17  ;;  %v1550_v10 = vmul.f32 0.5, %v1459_v37  ;;  %1157 = vtanh.f32 %v741_v18  ;;  %v624_v30 = vmul.f32 0.044715, %v1532_v22 }
 0x124   : > { %v831_v32 = vmul.f32 %v799_v21, %v1454_v63  ;;  %v833_v35 = vmul.f32 %v801_v15, %v577_v34  ;;  %v712_v36 = vadd.f32 %v680_v33, %v1467_v54  ;;  %v1556_v39 = vmul.f32 %v653_v20, %v1497_v31 }
 0x125   : > { %v686_v41 = vmul.f32 %v654_v38, %v1504_v45  ;;  %v625_v42 = vmul.f32 0.044715, %v1538_v25  ;;  %v714_v51 = vadd.f32 %v682_v53, %v1479_v44  ;;  %v626_v43 = vmul.f32 0.044715, %v1543_v27 }
 0x126   : > { %v1152_v37 = vpop.eup %1151  ;;  %v863_v55 = vpack.c.bf16 %v833_v35, %v831_v32  ;;  %v1563_v63 = vmul.f32 0.5, %v1467_v54  ;;  %v744_v34 = vmul.f32 0.7978846, %v712_v36  ;;  %v655_v6 = vmul.f32 %v623_v8, %v1527_v9 }
 0x127   : > { %v558_v50 = vpop.f32.mrb[28].mxu0  ;;  %v1154_v33 = vpop.eup %1153  ;;  %v804_v61 = vadd.f32 1.0, %v1152_v37  ;;  %v746_v1 = vmul.f32 0.7978846, %v714_v51  ;;  %v656_v53 = vmul.f32 %v624_v30, %v1532_v22  ;;  %v657_v54 = vmul.f32 %v625_v42, %v1538_v25 }
 0x128   : > { %v560_v57 = vpop.f32.mrb[29].mxu0  ;;  %v1565_v58 = vadd.f32 %v558_v50, %v382_v52  ;;  %916 = vmatpush1.bf16.msra.mxu1 %v863_v55  ;;  %v806_v7 = vadd.f32 1.0, %v1154_v33  ;;  %1159 = vtanh.f32 %v744_v34  ;;  %v658_v5 = vmul.f32 %v626_v43, %v1543_v27 }
 0x129   : > { %v1567_v60 = vadd.f32 %v560_v57, %v382_v52  ;;  %v562_v46 = vpop.f32.mrb[30].mxu0  ;;  %1161 = vtanh.f32 %v746_v1  ;;  %v836_v14 = vmul.f32 %v804_v61, %v1521_v4  ;;  %v711_v23 = vadd.f32 %v1509_v48, %v1465_v47 }
 0x12a   : > { %v564_v49 = vpop.f32.mrb[31].mxu0  ;;  %v1572_v40 = vadd.f32 %v562_v46, %v387_v2  ;;  %v838_v16 = vmul.f32 %v806_v7, %v582_v13  ;;  %v627_v17 = vmul.f32 0.044715, %v1565_v58  ;;  %v713_v12 = vadd.f32 %v1517_v62, %v1477_v3 }
 0x12b   : > { %v1574_v56 = vadd.f32 %v564_v49, %v387_v2  ;;  %v628_v11 = vmul.f32 0.044715, %v1567_v60  ;;  %v687_v38 = vmul.f32 %v655_v6, %v1527_v9  ;;  %v688_v21 = vmul.f32 %v656_v53, %v1532_v22 }
 0x12c   : > { %v1156_v24 = vpop.eup %1155  ;;  %v866_v18 = vpack.c.bf16 %v838_v16, %v836_v14  ;;  %v586_v15 = vmul.f32 0.5, %v1479_v44  ;;  %v689_v13 = vmul.f32 %v657_v54, %v1538_v25  ;;  %v629_v8 = vmul.f32 0.044715, %v1572_v40 }
 0x12d   : > { %v630_v20 = vmul.f32 0.044715, %v1574_v56  ;;  %v1158_v4 = vpop.eup %1157  ;;  %v803_v30 = vadd.f32 1.0, %v1156_v24  ;;  %v743_v32 = vmul.f32 0.7978846, %v711_v23  ;;  %v660_v48 = vmul.f32 %v628_v11, %v1567_v60 }
 0x12e   : > { %917 = vmatprep.subr.bf16.mxu1 %v866_v18  ;;  %v805_v35 = vadd.f32 1.0, %v1158_v4  ;;  %v745_v36 = vmul.f32 0.7978846, %v713_v12  ;;  %v690_v42 = vmul.f32 %v658_v5, %v1543_v27  ;;  %v659_v50 = vmul.f32 %v627_v17, %v1565_v58 }
 0x12f   : > { %v662_v62 = vmul.f32 %v630_v20, %v1574_v56  ;;  %1163 = vtanh.f32 %v743_v32  ;;  %v716_v44 = vadd.f32 %v1546_v28, %v1495_v29  ;;  %v835_v51 = vmul.f32 %v803_v30, %v1535_v59 }
 0x130   : > { %v837_v37 = vmul.f32 %v805_v35, %v1550_v10  ;;  %1165 = vtanh.f32 %v745_v36  ;;  %v718_v52 = vadd.f32 %v686_v41, %v1504_v45  ;;  %v661_v55 = vmul.f32 %v629_v8, %v1572_v40 }
 0x131   : > { %v748_v43 = vmul.f32 0.7978846, %v716_v44  ;;  %v715_v57 = vadd.f32 %v1541_v26, %v1491_v19  ;;  %v717_v34 = vadd.f32 %v1556_v39, %v1497_v31  ;;  %v692_v61 = vmul.f32 %v660_v48, %v1567_v60 }
 0x132   : > { %v1160_v33 = vpop.eup %1159  ;;  %v865_v28 = vpack.c.bf16 %v837_v37, %v835_v51  ;;  %v694_v59 = vmul.f32 %v662_v62, %v1574_v56  ;;  %v750_v46 = vmul.f32 0.7978846, %v718_v52  ;;  %v720_v26 = vadd.f32 %v688_v21, %v1532_v22 }
 0x133   : > { %v1162_v10 = vpop.eup %1161  ;;  %v808_v1 = vadd.f32 1.0, %v1160_v33  ;;  %1167 = vtanh.f32 %v748_v43  ;;  %v747_v41 = vmul.f32 0.7978846, %v715_v57  ;;  %v749_v2 = vmul.f32 0.7978846, %v717_v34 }
 0x134   : > { %918 = vmatpush1.bf16.msra.mxu1 %v865_v28  ;;  %v810_v6 = vadd.f32 1.0, %v1162_v10  ;;  %1169 = vtanh.f32 %v750_v46  ;;  %v722_v53 = vadd.f32 %v690_v42, %v1543_v27  ;;  %v752_v49 = vmul.f32 0.7978846, %v720_v26 }
 0x135   : > { %v840_v39 = vmul.f32 %v808_v1, %v1563_v63  ;;  %1171 = vtanh.f32 %v747_v41  ;;  %v691_v5 = vmul.f32 %v659_v50, %v1565_v58  ;;  %v693_v11 = vmul.f32 %v661_v55, %v1572_v40 }
 0x136   : > { %v842_v7 = vmul.f32 %v810_v6, %v586_v15  ;;  %1173 = vtanh.f32 %v749_v2  ;;  %v754_v54 = vmul.f32 0.7978846, %v722_v53  ;;  %v719_v14 = vadd.f32 %v687_v38, %v1527_v9 }
 0x137   : > { %v721_v16 = vadd.f32 %v689_v13, %v1538_v25  ;;  %1175 = vtanh.f32 %v752_v49  ;;  %v724_v20 = vadd.f32 %v692_v61, %v1567_v60  ;;  %v726_v23 = vadd.f32 %v694_v59, %v1574_v56 }
 0x138   : > { %v868_v17 = vpack.c.bf16 %v842_v7, %v840_v39  ;;  %v583_v12 = vmul.f32 0.5, %v1465_v47  ;;  %1177 = vtanh.f32 %v754_v54  ;;  %v751_v24 = vmul.f32 0.7978846, %v719_v14 }
 0x139   : > { %v1164_v63 = vpop.eup %1163  ;;  %v753_v21 = vmul.f32 0.7978846, %v721_v16  ;;  %v585_v15 = vmul.f32 0.5, %v1477_v3  ;;  %v756_v38 = vmul.f32 0.7978846, %v724_v20  ;;  %v723_v30 = vadd.f32 %v691_v5, %v1565_v58 }
 0x13a   : > { %v1166_v18 = vpop.eup %1165  ;;  %919 = vmatprep.subr.bf16.mxu1 %v868_v17  ;;  %v807_v4 = vadd.f32 1.0, %v1164_v63  ;;  %v758_v8 = vmul.f32 0.7978846, %v726_v23  ;;  %1179 = vtanh.f32 %v751_v24  ;;  %v725_v32 = vadd.f32 %v693_v11, %v1572_v40 }
 0x13b   : > { %v809_v13 = vadd.f32 1.0, %v1166_v18  ;;  %1181 = vtanh.f32 %v753_v21  ;;  %v755_v62 = vmul.f32 0.7978846, %v723_v30  ;;  %v588_v50 = vmul.f32 0.5, %v1495_v29 }
 0x13c   : > { %v839_v48 = vmul.f32 %v807_v4, %v583_v12  ;;  %1183 = vtanh.f32 %v756_v38  ;;  %v757_v36 = vmul.f32 0.7978846, %v725_v32  ;;  %v590_v37 = vmul.f32 0.5, %v1504_v45 }
 0x13d   : > { %v1168_v35 = vpop.eup %1167  ;;  %v841_v47 = vmul.f32 %v809_v13, %v585_v15  ;;  %1185 = vtanh.f32 %v758_v8  ;;  %v587_v43 = vmul.f32 0.5, %v1491_v19  ;;  %v589_v61 = vmul.f32 0.5, %v1497_v31 }
 0x13e   : > { %v1170_v42 = vpop.eup %1169  ;;  %v812_v3 = vadd.f32 1.0, %v1168_v35  ;;  %1187 = vtanh.f32 %v755_v62  ;;  %v592_v45 = vmul.f32 0.5, %v1532_v22  ;;  %v594_v2 = vmul.f32 0.5, %v1543_v27 }
 0x13f   : > { %v1172_v44 = vpop.eup %1171  ;;  %v867_v51 = vpack.c.bf16 %v841_v47, %v839_v48  ;;  %v814_v52 = vadd.f32 1.0, %v1170_v42  ;;  %1189 = vtanh.f32 %v757_v36  ;;  %v591_v54 = vmul.f32 0.5, %v1527_v9  ;;  %v887_v47 = vpop.permute.xlu1 %886 }
 0x140   : > { %v1174_v55 = vpop.eup %1173  ;;  %v811_v57 = vadd.f32 1.0, %v1172_v44  ;;  %v844_v34 = vmul.f32 %v812_v3, %v588_v50  ;;  %v593_v5 = vmul.f32 0.5, %v1538_v25  ;;  %v596_v22 = vmul.f32 0.5, %v1567_v60 }
 0x141   : > { %920 = vmatpush1.bf16.msra.mxu1 %v867_v51  ;;  %v846_v33 = vmul.f32 %v814_v52, %v590_v37  ;;  %v813_v28 = vadd.f32 1.0, %v1174_v55  ;;  %v1176_v29 = vpop.eup %1175  ;;  %v598_v63 = vmul.f32 0.5, %v1574_v56  ;;  %v595_v21 = vmul.f32 0.5, %v1565_v58  ;;  %v1125_v56 = vld [vmem:[%s1655_s3] sm:$0xff]   ;;  %v1126_v58 = vld [vmem:[%s1655_s3 + $0x8] sm:$0xff]  }
 0x142   : > { %v1178_v59 = vpop.eup %1177  ;;  %v843_v10 = vmul.f32 %v811_v57, %v587_v43  ;;  %v816_v41 = vadd.f32 1.0, %v1176_v29  ;;  %v597_v9 = vmul.f32 0.5, %v1572_v40  ;;  %v882_v40 = vpop.permute.xlu0 %881 }
 0x143   : > { %v870_v46 = vpack.c.bf16 %v846_v33, %v844_v34  ;;  %v845_v1 = vmul.f32 %v813_v28, %v589_v61  ;;  %v818_v6 = vadd.f32 1.0, %v1178_v59  ;;  %v897_v52 = vpop.permute.xlu1 %896 }
 0x144   : > { %v1180_v19 = vpop.eup %1179  ;;  %v848_v39 = vmul.f32 %v816_v41, %v592_v45 }
 0x145   : > { %921 = vmatprep.subr.bf16.mxu1 %v870_v46  ;;  %v869_v26 = vpack.c.bf16 %v845_v1, %v843_v10  ;;  %v1182_v53 = vpop.eup %1181  ;;  %v850_v7 = vmul.f32 %v818_v6, %v594_v2  ;;  %v815_v49 = vadd.f32 1.0, %v1180_v19 }
 0x146   : > { %v1184_v31 = vpop.eup %1183  ;;  %v817_v11 = vadd.f32 1.0, %v1182_v53  ;;  %v892_v3 = vpop.permute.xlu0 %891 }
 0x147   : > { %922 = vmatpush1.bf16.msra.mxu1 %v869_v26  ;;  %v1186_v14 = vpop.eup %1185  ;;  %v872_v16 = vpack.c.bf16 %v850_v7, %v848_v39  ;;  %v820_v27 = vadd.f32 1.0, %v1184_v31  ;;  %v847_v20 = vmul.f32 %v815_v49, %v591_v54 }
 0x148   : > { %v1188_v17 = vpop.eup %1187  ;;  %v849_v23 = vmul.f32 %v817_v11, %v593_v5  ;;  %v822_v12 = vadd.f32 1.0, %v1186_v14 }
 0x149   : > { %v1190_v24 = vpop.eup %1189  ;;  %923 = vmatprep.subr.bf16.mxu1 %v872_v16  ;;  %v819_v18 = vadd.f32 1.0, %v1188_v17  ;;  %v852_v15 = vmul.f32 %v820_v27, %v596_v22 }
 0x14a   : > { %v871_v25 = vpack.c.bf16 %v849_v23, %v847_v20  ;;  %v854_v4 = vmul.f32 %v822_v12, %v598_v63  ;;  %v821_v38 = vadd.f32 1.0, %v1190_v24 }
 0x14b   : > { %v851_v8 = vmul.f32 %v819_v18, %v595_v21 }
 0x14c   : > { %924 = vmatpush1.bf16.msra.mxu1 %v871_v25  ;;  %v874_v60 = vpack.c.bf16 %v854_v4, %v852_v15  ;;  %v853_v13 = vmul.f32 %v821_v38, %v597_v9 }
 0x14e   : > { %925 = vmatprep.subr.bf16.mxu1 %v874_v60  ;;  %v873_v30 = vpack.c.bf16 %v853_v13, %v851_v8 }
 0x150   : > { %926 = vmatpush1.bf16.msra.mxu1 %v873_v30 }
 0x153   : > { %944 = vmatmul.mubr.bf16.vlgmr.msra.gmra.mrb[0].mxu1 %v1125_v56 }
 0x154   : > { %953 = vmatprep.mubr.bf16.mxu1 %v1215_v0 }
 0x15b   : > { %954 = vmatmul.mubr.bf16.gmra.mrb[4].mxu1 %v1126_v58 }
 0x226   : > { %v945_v32 = vpop.f32.mrb[0].mxu1 }
 0x227   : > { %v946_v48 = vadd.f32 %v945_v32, %v882_v40  ;;  %v947_v35 = vpop.f32.mrb[1].mxu1 }
 0x228   : > { %v948_v62 = vadd.f32 %v947_v35, %v882_v40  ;;  %v949_v36 = vpop.f32.mrb[2].mxu1 }
 0x229   : > { %964 = vst [vmem:[%s262_s28] sm:$0xff] %v946_v48  ;;  %v950_v42 = vadd.f32 %v949_v36, %v887_v47  ;;  %v951_v0 = vpop.f32.mrb[3].mxu1 }
 0x22a   : > { %965 = vst [vmem:[%s262_s28 + $0x8] sm:$0xff] %v948_v62  ;;  %v952_v50 = vadd.f32 %v951_v0, %v887_v47 }
 0x22b   : > { %966 = vst [vmem:[%s262_s28 + $0x10] sm:$0xff] %v950_v42 }
 0x22c   : > { %967 = vst [vmem:[%s262_s28 + $0x18] sm:$0xff] %v952_v50 }
 0x22e   : > { %v955_v44 = vpop.f32.mrb[4].mxu1 }
 0x22f   : > { %v956_v51 = vadd.f32 %v955_v44, %v892_v3  ;;  %v957_v37 = vpop.f32.mrb[5].mxu1 }
 0x230   : > { %v958_v55 = vadd.f32 %v957_v37, %v892_v3  ;;  %v959_v43 = vpop.f32.mrb[6].mxu1 }
 0x231   : > { %968 = vst [vmem:[%s262_s28 + $0x20] sm:$0xff] %v956_v51  ;;  %v960_v57 = vadd.f32 %v959_v43, %v897_v52  ;;  %v961_v34 = vpop.f32.mrb[7].mxu1 }
 0x232   : > { %969 = vst [vmem:[%s262_s28 + $0x28] sm:$0xff] %v958_v55  ;;  %v962_v33 = vadd.f32 %v961_v34, %v897_v52 }
 0x233   : > { %970 = vst [vmem:[%s262_s28 + $0x30] sm:$0xff] %v960_v57 }
 0x234   : > { %971 = vst [vmem:[%s262_s28 + $0x38] sm:$0xff] %v962_v33 }
 0x235 PF: > { %s15_s20 = sadd.s32 1, %s1213_s20   ;;  %s1658_s18 = smov %s1209_s19 }
 0x236   : > { %p12_p5 = scmp.ge.s32.totalorder %s15_s20, 4   ;;  %s1659_s19 = smov %s1661_s21 }
 0x238   :  { %14 = sbr.rel (!%p12_p5) target bundleno = 2 (0x2), region = 70 }

</bundles_post_ra>
